<compile_context>
chip_gen: v6e
topology: v6e:2x2x1
jax: 0.10.0
libtpu: 0.0.40
codegen_flags: <defaults>
</compile_context>

<pallas_src>
import functools

import numpy as np
import jax
import jax.numpy as jnp
from jax.experimental import pallas as pl
from jax.experimental.pallas import tpu as pltpu

# ----------------------------- configuration -------------------------------
N, H, W = 2, 16, 16
INPLANES = 16          # must equal planes * expansion so downsample=None works
PLANES = 4
EXPANSION = 4
GROUPS = 2
BASE_WIDTH = 64
STRIDE = 1
DILATION = 1
WIDTH = int(PLANES * (BASE_WIDTH / 64.0)) * GROUPS          # = 8
COUT = PLANES * EXPANSION                                    # = 16
BN_EPS = 1e-5


# ------------------------------ fused kernel --------------------------------
def _bottleneck_kernel(x_ref, w1_ref, w2_ref, w3_ref,
                       b1_ref, b2_ref, b3_ref, mask_ref,
                       o_ref, h1p_ref, *, H, W):
    """One batch element: conv1+bn1+relu -> grouped conv3x3+bn2+relu ->
    conv3+bn3 + residual + relu, entirely in VMEM."""
    M = H * W
    PADL = W + 1                                   # max |tap shift| = W + 1

    x = x_ref[0]                                   # (INPLANES, M) f32 (identity)

    # ---- conv1 (1x1) + bn1 + relu :  (WIDTH, Cin) @ (Cin, M) ---------------
    h1 = jnp.dot(w1_ref[...], x.astype(jnp.bfloat16),
                 preferred_element_type=jnp.float32)
    h1 = jnp.maximum(h1 + b1_ref[...], 0.0)        # (WIDTH, M) f32

    # ---- grouped 3x3 conv + bn2 + relu as ONE im2col matmul ----------------
    # zero-padded scratch along the flattened spatial (lane) axis; the 9 taps
    # are contiguous static lane slices, border wrap killed by the masks.
    h1p_ref[...] = jnp.zeros(h1p_ref.shape, h1p_ref.dtype)
    h1p_ref[:, PADL:PADL + M] = h1
    taps = []
    for ky in range(3):
        for kx in range(3):
            t = ky * 3 + kx
            d = (ky - 1) * W + (kx - 1)            # flattened spatial shift
            shifted = h1p_ref[:, PADL + d:PADL + d + M]      # (WIDTH, M)
            taps.append(shifted * mask_ref[t:t + 1, :])
    patches = jnp.concatenate(taps, axis=0)        # (9*WIDTH, M) f32
    h2 = jnp.dot(w2_ref[...], patches.astype(jnp.bfloat16),
                 preferred_element_type=jnp.float32)
    h2 = jnp.maximum(h2 + b2_ref[...], 0.0)        # (WIDTH, M) f32

    # ---- conv3 (1x1) + bn3 + residual add + relu ---------------------------
    y = jnp.dot(w3_ref[...], h2.astype(jnp.bfloat16),
                preferred_element_type=jnp.float32)
    o_ref[0] = jnp.maximum(y + b3_ref[...] + x, 0.0).astype(o_ref.dtype)


# ------------------------------ wrapper --------------------------------------
def _fold_bn(gamma, beta, mean, var, eps=BN_EPS):
    scale = gamma / jnp.sqrt(var + eps)
    bias = beta - mean * scale
    return scale, bias


def _make_tap_masks(h, w):
    """(9, h*w) f32 masks over the OUTPUT position: 1 where tap (ky,kx) reads a
    valid (non-padding) input pixel for stride=1, dilation=1, pad=1."""
    masks = np.zeros((9, h * w), np.float32)
    hh, ww = np.meshgrid(np.arange(h), np.arange(w), indexing="ij")
    for ky in range(3):
        for kx in range(3):
            valid = ((hh + ky - 1 >= 0) & (hh + ky - 1 < h) &
                     (ww + kx - 1 >= 0) & (ww + kx - 1 < w))
            masks[ky * 3 + kx] = valid.reshape(-1).astype(np.float32)
    return jnp.asarray(masks)


def bottleneck_forward(x_nchw, p):
    """Pallas implementation of Bottleneck.forward (downsample=None)."""
    n, cin, h, w = x_nchw.shape
    assert cin == INPLANES
    # identity path requires stride==1 and Cout == INPLANES (downsample=None)
    assert STRIDE == 1 and DILATION == 1 and INPLANES == COUT
    m = h * w
    x = x_nchw.reshape(n, cin, m).astype(jnp.float32)        # NCHW, no transpose

    s1, b1 = _fold_bn(*p["bn1"])
    s2, b2 = _fold_bn(*p["bn2"])
    s3, b3 = _fold_bn(*p["bn3"])

    # fold BN scales into weights; bf16 MXU operands
    w1 = (p["w1"][:, :, 0, 0] * s1[:, None]).astype(jnp.bfloat16)   # (WIDTH, Cin)
    w3 = (p["w3"][:, :, 0, 0] * s3[:, None]).astype(jnp.bfloat16)   # (COUT, WIDTH)

    # grouped 3x3 weight -> block-diagonal full weight -> im2col (WIDTH, 9*WIDTH)
    cog = WIDTH // GROUPS
    cig = WIDTH // GROUPS
    w2_full = jnp.zeros((WIDTH, WIDTH, 3, 3), jnp.float32)
    for g in range(GROUPS):
        w2_full = w2_full.at[g * cog:(g + 1) * cog,
                             g * cig:(g + 1) * cig].set(
            p["w2"][g * cog:(g + 1) * cog])
    w2_full = w2_full * s2[:, None, None, None]
    # (o, i, ky, kx) -> (o, ky, kx, i) -> (o, t*WIDTH + i) with t = ky*3 + kx
    w2_col = jnp.transpose(w2_full, (0, 2, 3, 1)).reshape(
        WIDTH, 9 * WIDTH).astype(jnp.bfloat16)

    masks = _make_tap_masks(h, w)                            # (9, m) f32

    kern = functools.partial(_bottleneck_kernel, H=h, W=w)

    out = pl.pallas_call(
        kern,
        out_shape=jax.ShapeDtypeStruct((n, COUT, m), jnp.float32),
        grid=(n,),
        in_specs=[
            pl.BlockSpec((1, INPLANES, m), lambda b: (b, 0, 0)),   # x
            pl.BlockSpec((WIDTH, INPLANES), lambda b: (0, 0)),     # w1
            pl.BlockSpec((WIDTH, 9 * WIDTH), lambda b: (0, 0)),    # w2 im2col
            pl.BlockSpec((COUT, WIDTH), lambda b: (0, 0)),         # w3
            pl.BlockSpec((WIDTH, 1), lambda b: (0, 0)),            # b1
            pl.BlockSpec((WIDTH, 1), lambda b: (0, 0)),            # b2
            pl.BlockSpec((COUT, 1), lambda b: (0, 0)),             # b3
            pl.BlockSpec((9, m), lambda b: (0, 0)),                # tap masks
        ],
        out_specs=pl.BlockSpec((1, COUT, m), lambda b: (b, 0, 0)),
        scratch_shapes=[pltpu.VMEM((WIDTH, m + 2 * (w + 1)), jnp.float32)],
        compiler_params=pltpu.CompilerParams(
            dimension_semantics=("parallel",)),
    )(x, w1, w2_col, w3,
      b1.reshape(-1, 1), b2.reshape(-1, 1), b3.reshape(-1, 1), masks)

    # contiguous reshape only (no transpose): (N, COUT, H*W) -> (N, COUT, H, W)
    return out.reshape(n, COUT, h, w)


# --------------------------- pure-JAX reference ------------------------------
def _reference(x_nchw, p):
    def conv(x, wgt, stride=1, padding=0, groups=1, dilation=1):
        return jax.lax.conv_general_dilated(
            x, wgt, window_strides=(stride, stride),
            padding=[(padding, padding), (padding, padding)],
            rhs_dilation=(dilation, dilation),
            dimension_numbers=("NCHW", "OIHW", "NCHW"),
            feature_group_count=groups)

    def bn(x, bnp):
        s, b = _fold_bn(*bnp)
        return x * s[None, :, None, None] + b[None, :, None, None]

    out = jax.nn.relu(bn(conv(x_nchw, p["w1"]), p["bn1"]))
    out = jax.nn.relu(bn(conv(out, p["w2"], stride=STRIDE, padding=DILATION,
                              groups=GROUPS, dilation=DILATION), p["bn2"]))
    out = bn(conv(out, p["w3"]), p["bn3"])
    return jax.nn.relu(out + x_nchw)


# ------------------------------- main ----------------------------------------
def _make_params(key):
    ks = jax.random.split(key, 12)

    def bn_params(k, c):
        k1, k2, k3, k4 = jax.random.split(k, 4)
        gamma = 1.0 + 0.1 * jax.random.normal(k1, (c,), jnp.float32)
        beta = 0.1 * jax.random.normal(k2, (c,), jnp.float32)
        mean = 0.1 * jax.random.normal(k3, (c,), jnp.float32)
        var = 1.0 + 0.1 * jnp.abs(jax.random.normal(k4, (c,), jnp.float32))
        return (gamma, beta, mean, var)

    return {
        "w1": 0.1 * jax.random.normal(ks[0], (WIDTH, INPLANES, 1, 1), jnp.float32),
        "bn1": bn_params(ks[1], WIDTH),
        "w2": 0.1 * jax.random.normal(ks[2], (WIDTH, WIDTH // GROUPS, 3, 3),
                                      jnp.float32),
        "bn2": bn_params(ks[3], WIDTH),
        "w3": 0.1 * jax.random.normal(ks[4], (COUT, WIDTH, 1, 1), jnp.float32),
        "bn3": bn_params(ks[5], COUT),
    }


if __name__ == "__main__":
    key = jax.random.PRNGKey(0)
    kx, kp = jax.random.split(key)
    x = jax.random.normal(kx, (N, INPLANES, H, W), jnp.float32)   # NCHW input
    params = _make_params(kp)

    out = bottleneck_forward(x, params)
    out = jax.block_until_ready(out)

    ref = jax.block_until_ready(_reference(x, params))
    assert out.shape == (N, COUT, H, W), out.shape
    # tolerance loosened vs. the pure-f32 reference because matmul operands are
    # bf16 (f32 accumulation / f32 epilogue)
    max_err = float(jnp.max(jnp.abs(out - ref)))
    assert jnp.allclose(out, ref, atol=5e-2, rtol=5e-2), max_err

    # TODO(synk): downsample branch and general stride>1 / dilation>1 paths are
    # not implemented since this module instance has downsample=None, stride=1.
    print("KERNEL_OK")
</pallas_src>

<mosaic_0001>
module attributes {stable_mosaic.version = 11 : i64} {
  func.func @_bottleneck_kernel(%arg0: i32, %arg1: memref<1x16x256xf32, #tpu.memory_space<vmem>>, %arg2: memref<8x16xbf16, #tpu.memory_space<vmem>>, %arg3: memref<8x72xbf16, #tpu.memory_space<vmem>>, %arg4: memref<16x8xbf16, #tpu.memory_space<vmem>>, %arg5: memref<8x1xf32, #tpu.memory_space<vmem>>, %arg6: memref<8x1xf32, #tpu.memory_space<vmem>>, %arg7: memref<16x1xf32, #tpu.memory_space<vmem>>, %arg8: memref<9x256xf32, #tpu.memory_space<vmem>>, %arg9: memref<1x16x256xf32, #tpu.memory_space<vmem>>, %arg10: memref<8x290xf32, #tpu.memory_space<vmem>>) attributes {dimension_semantics = [#tpu.dimension_semantics<parallel>], iteration_bounds = array<i64: 2>, scalar_prefetch = 0 : i64, scratch_operands = 1 : i64, tpu.core_type = #tpu.core_type<tc>, window_params = [{transform_indices = @transform_0, window_bounds = array<i64: 1, 16, 256>}, {pipeline_mode = #tpu.pipeline_mode<synchronous>, transform_indices = @transform_1, window_bounds = array<i64: 8, 16>}, {pipeline_mode = #tpu.pipeline_mode<synchronous>, transform_indices = @transform_2, window_bounds = array<i64: 8, 72>}, {pipeline_mode = #tpu.pipeline_mode<synchronous>, transform_indices = @transform_3, window_bounds = array<i64: 16, 8>}, {pipeline_mode = #tpu.pipeline_mode<synchronous>, transform_indices = @transform_4, window_bounds = array<i64: 8, 1>}, {pipeline_mode = #tpu.pipeline_mode<synchronous>, transform_indices = @transform_5, window_bounds = array<i64: 8, 1>}, {pipeline_mode = #tpu.pipeline_mode<synchronous>, transform_indices = @transform_6, window_bounds = array<i64: 16, 1>}, {pipeline_mode = #tpu.pipeline_mode<synchronous>, transform_indices = @transform_7, window_bounds = array<i64: 9, 256>}, {transform_indices = @transform_8, window_bounds = array<i64: 1, 16, 256>}]} {
    %c0 = arith.constant 0 : index
    %c0_0 = arith.constant 0 : index
    %c0_1 = arith.constant 0 : index
    %0 = vector.load %arg1[%c0, %c0_0, %c0_1] : memref<1x16x256xf32, #tpu.memory_space<vmem>>, vector<1x16x256xf32>
    %1 = vector.shape_cast %0 : vector<1x16x256xf32> to vector<16x256xf32>
    %c0_2 = arith.constant 0 : index
    %c0_3 = arith.constant 0 : index
    %2 = vector.load %arg2[%c0_2, %c0_3] : memref<8x16xbf16, #tpu.memory_space<vmem>>, vector<8x16xbf16>
    %3 = arith.truncf %1 : vector<16x256xf32> to vector<16x256xbf16>
    %cst = arith.constant dense<0.000000e+00> : vector<8x256xf32>
    %4 = tpu.matmul %2, %3, %cst {dimension_numbers = #tpu.dot_dimension_numbers<[1], [0], [0], [1], [0, 0, 1, 1], [], []>} : vector<8x16xbf16>, vector<16x256xbf16>, vector<8x256xf32> -> vector<8x256xf32>
    %c0_4 = arith.constant 0 : index
    %c0_5 = arith.constant 0 : index
    %5 = vector.load %arg5[%c0_4, %c0_5] : memref<8x1xf32, #tpu.memory_space<vmem>>, vector<8x1xf32>
    %6 = vector.broadcast %5 : vector<8x1xf32> to vector<8x256xf32>
    %7 = arith.addf %4, %6 : vector<8x256xf32>
    %cst_6 = arith.constant 0.000000e+00 : f32
    %8 = vector.broadcast %cst_6 : f32 to vector<8x256xf32>
    %9 = arith.maximumf %7, %8 : vector<8x256xf32>
    %cst_7 = arith.constant 0.000000e+00 : f32
    %10 = vector.broadcast %cst_7 : f32 to vector<8x290xf32>
    %c0_8 = arith.constant 0 : index
    %c0_9 = arith.constant 0 : index
    %11 = vector.load %arg10[%c0_8, %c0_9] : memref<8x290xf32, #tpu.memory_space<vmem>>, vector<8x290xf32>
    tpu.vector_store %arg10[%c0_8, %c0_9], %10 {strides = array<i32>} : memref<8x290xf32, #tpu.memory_space<vmem>>, vector<8x290xf32>,
    %c0_10 = arith.constant 0 : index
    %c17 = arith.constant 17 : index
    %12 = vector.load %arg10[%c0_10, %c17] : memref<8x290xf32, #tpu.memory_space<vmem>>, vector<8x256xf32>
    tpu.vector_store %arg10[%c0_10, %c17], %9 {strides = array<i32>} : memref<8x290xf32, #tpu.memory_space<vmem>>, vector<8x256xf32>,
    %c0_11 = arith.constant 0 : index
    %c0_12 = arith.constant 0 : index
    %13 = vector.load %arg10[%c0_11, %c0_12] : memref<8x290xf32, #tpu.memory_space<vmem>>, vector<8x256xf32>
    %c0_13 = arith.constant 0 : index
    %c0_14 = arith.constant 0 : index
    %14 = vector.load %arg8[%c0_13, %c0_14] : memref<9x256xf32, #tpu.memory_space<vmem>>, vector<1x256xf32>
    %15 = vector.broadcast %14 : vector<1x256xf32> to vector<8x256xf32>
    %16 = arith.mulf %13, %15 : vector<8x256xf32>
    %c0_15 = arith.constant 0 : index
    %c1 = arith.constant 1 : index
    %17 = vector.load %arg10[%c0_15, %c1] : memref<8x290xf32, #tpu.memory_space<vmem>>, vector<8x256xf32>
    %c1_16 = arith.constant 1 : index
    %c0_17 = arith.constant 0 : index
    %18 = vector.load %arg8[%c1_16, %c0_17] : memref<9x256xf32, #tpu.memory_space<vmem>>, vector<1x256xf32>
    %19 = vector.broadcast %18 : vector<1x256xf32> to vector<8x256xf32>
    %20 = arith.mulf %17, %19 : vector<8x256xf32>
    %c0_18 = arith.constant 0 : index
    %c2 = arith.constant 2 : index
    %21 = vector.load %arg10[%c0_18, %c2] : memref<8x290xf32, #tpu.memory_space<vmem>>, vector<8x256xf32>
    %c2_19 = arith.constant 2 : index
    %c0_20 = arith.constant 0 : index
    %22 = vector.load %arg8[%c2_19, %c0_20] : memref<9x256xf32, #tpu.memory_space<vmem>>, vector<1x256xf32>
    %23 = vector.broadcast %22 : vector<1x256xf32> to vector<8x256xf32>
    %24 = arith.mulf %21, %23 : vector<8x256xf32>
    %c0_21 = arith.constant 0 : index
    %c16 = arith.constant 16 : index
    %25 = vector.load %arg10[%c0_21, %c16] : memref<8x290xf32, #tpu.memory_space<vmem>>, vector<8x256xf32>
    %c3 = arith.constant 3 : index
    %c0_22 = arith.constant 0 : index
    %26 = vector.load %arg8[%c3, %c0_22] : memref<9x256xf32, #tpu.memory_space<vmem>>, vector<1x256xf32>
    %27 = vector.broadcast %26 : vector<1x256xf32> to vector<8x256xf32>
    %28 = arith.mulf %25, %27 : vector<8x256xf32>
    %c0_23 = arith.constant 0 : index
    %c17_24 = arith.constant 17 : index
    %29 = vector.load %arg10[%c0_23, %c17_24] : memref<8x290xf32, #tpu.memory_space<vmem>>, vector<8x256xf32>
    %c4 = arith.constant 4 : index
    %c0_25 = arith.constant 0 : index
    %30 = vector.load %arg8[%c4, %c0_25] : memref<9x256xf32, #tpu.memory_space<vmem>>, vector<1x256xf32>
    %31 = vector.broadcast %30 : vector<1x256xf32> to vector<8x256xf32>
    %32 = arith.mulf %29, %31 : vector<8x256xf32>
    %c0_26 = arith.constant 0 : index
    %c18 = arith.constant 18 : index
    %33 = vector.load %arg10[%c0_26, %c18] : memref<8x290xf32, #tpu.memory_space<vmem>>, vector<8x256xf32>
    %c5 = arith.constant 5 : index
    %c0_27 = arith.constant 0 : index
    %34 = vector.load %arg8[%c5, %c0_27] : memref<9x256xf32, #tpu.memory_space<vmem>>, vector<1x256xf32>
    %35 = vector.broadcast %34 : vector<1x256xf32> to vector<8x256xf32>
    %36 = arith.mulf %33, %35 : vector<8x256xf32>
    %c0_28 = arith.constant 0 : index
    %c32 = arith.constant 32 : index
    %37 = vector.load %arg10[%c0_28, %c32] : memref<8x290xf32, #tpu.memory_space<vmem>>, vector<8x256xf32>
    %c6 = arith.constant 6 : index
    %c0_29 = arith.constant 0 : index
    %38 = vector.load %arg8[%c6, %c0_29] : memref<9x256xf32, #tpu.memory_space<vmem>>, vector<1x256xf32>
    %39 = vector.broadcast %38 : vector<1x256xf32> to vector<8x256xf32>
    %40 = arith.mulf %37, %39 : vector<8x256xf32>
    %c0_30 = arith.constant 0 : index
    %c33 = arith.constant 33 : index
    %41 = vector.load %arg10[%c0_30, %c33] : memref<8x290xf32, #tpu.memory_space<vmem>>, vector<8x256xf32>
    %c7 = arith.constant 7 : index
    %c0_31 = arith.constant 0 : index
    %42 = vector.load %arg8[%c7, %c0_31] : memref<9x256xf32, #tpu.memory_space<vmem>>, vector<1x256xf32>
    %43 = vector.broadcast %42 : vector<1x256xf32> to vector<8x256xf32>
    %44 = arith.mulf %41, %43 : vector<8x256xf32>
    %c0_32 = arith.constant 0 : index
    %c34 = arith.constant 34 : index
    %45 = vector.load %arg10[%c0_32, %c34] : memref<8x290xf32, #tpu.memory_space<vmem>>, vector<8x256xf32>
    %c8 = arith.constant 8 : index
    %c0_33 = arith.constant 0 : index
    %46 = vector.load %arg8[%c8, %c0_33] : memref<9x256xf32, #tpu.memory_space<vmem>>, vector<1x256xf32>
    %47 = vector.broadcast %46 : vector<1x256xf32> to vector<8x256xf32>
    %48 = arith.mulf %45, %47 : vector<8x256xf32>
    %49 = tpu.concatenate %16, %20, %24, %28, %32, %36, %40, %44, %48 in 0 : vector<8x256xf32>, vector<8x256xf32>, vector<8x256xf32>, vector<8x256xf32>, vector<8x256xf32>, vector<8x256xf32>, vector<8x256xf32>, vector<8x256xf32>, vector<8x256xf32> -> vector<72x256xf32>
    %c0_34 = arith.constant 0 : index
    %c0_35 = arith.constant 0 : index
    %50 = vector.load %arg3[%c0_34, %c0_35] : memref<8x72xbf16, #tpu.memory_space<vmem>>, vector<8x72xbf16>
    %51 = arith.truncf %49 : vector<72x256xf32> to vector<72x256xbf16>
    %cst_36 = arith.constant dense<0.000000e+00> : vector<8x256xf32>
    %52 = tpu.matmul %50, %51, %cst_36 {dimension_numbers = #tpu.dot_dimension_numbers<[1], [0], [0], [1], [0, 0, 1, 1], [], []>} : vector<8x72xbf16>, vector<72x256xbf16>, vector<8x256xf32> -> vector<8x256xf32>
    %c0_37 = arith.constant 0 : index
    %c0_38 = arith.constant 0 : index
    %53 = vector.load %arg6[%c0_37, %c0_38] : memref<8x1xf32, #tpu.memory_space<vmem>>, vector<8x1xf32>
    %54 = vector.broadcast %53 : vector<8x1xf32> to vector<8x256xf32>
    %55 = arith.addf %52, %54 : vector<8x256xf32>
    %cst_39 = arith.constant 0.000000e+00 : f32
    %56 = vector.broadcast %cst_39 : f32 to vector<8x256xf32>
    %57 = arith.maximumf %55, %56 : vector<8x256xf32>
    %c0_40 = arith.constant 0 : index
    %c0_41 = arith.constant 0 : index
    %58 = vector.load %arg4[%c0_40, %c0_41] : memref<16x8xbf16, #tpu.memory_space<vmem>>, vector<16x8xbf16>
    %59 = arith.truncf %57 : vector<8x256xf32> to vector<8x256xbf16>
    %cst_42 = arith.constant dense<0.000000e+00> : vector<16x256xf32>
    %60 = tpu.matmul %58, %59, %cst_42 {dimension_numbers = #tpu.dot_dimension_numbers<[1], [0], [0], [1], [0, 0, 1, 1], [], []>} : vector<16x8xbf16>, vector<8x256xbf16>, vector<16x256xf32> -> vector<16x256xf32>
    %c0_43 = arith.constant 0 : index
    %c0_44 = arith.constant 0 : index
    %61 = vector.load %arg7[%c0_43, %c0_44] : memref<16x1xf32, #tpu.memory_space<vmem>>, vector<16x1xf32>
    %62 = vector.broadcast %61 : vector<16x1xf32> to vector<16x256xf32>
    %63 = arith.addf %60, %62 : vector<16x256xf32>
    %64 = arith.addf %63, %1 : vector<16x256xf32>
    %cst_45 = arith.constant 0.000000e+00 : f32
    %65 = vector.broadcast %cst_45 : f32 to vector<16x256xf32>
    %66 = arith.maximumf %64, %65 : vector<16x256xf32>
    %c0_46 = arith.constant 0 : index
    %c0_47 = arith.constant 0 : index
    %c0_48 = arith.constant 0 : index
    %67 = vector.load %arg9[%c0_46, %c0_47, %c0_48] : memref<1x16x256xf32, #tpu.memory_space<vmem>>, vector<1x16x256xf32>
    %68 = vector.shape_cast %67 : vector<1x16x256xf32> to vector<16x256xf32>
    %69 = vector.shape_cast %66 : vector<16x256xf32> to vector<1x16x256xf32>
    tpu.vector_store %arg9[%c0_46, %c0_47, %c0_48], %69 {strides = array<i32>} : memref<1x16x256xf32, #tpu.memory_space<vmem>>, vector<1x16x256xf32>,
    return
  }
  func.func @transform_0(%arg0: i32) -> (i32, i32, i32) {
    %c0_i32 = arith.constant 0 : i32
    %c0_i32_0 = arith.constant 0 : i32
    %c0_i32_1 = arith.constant 0 : i32
    return %arg0, %c0_i32, %c0_i32_0 : i32, i32, i32
  }
  func.func @transform_1(%arg0: i32) -> (i32, i32) {
    %c0_i32 = arith.constant 0 : i32
    %c0_i32_0 = arith.constant 0 : i32
    %c0_i32_1 = arith.constant 0 : i32
    return %c0_i32, %c0_i32_0 : i32, i32
  }
  func.func @transform_2(%arg0: i32) -> (i32, i32) {
    %c0_i32 = arith.constant 0 : i32
    %c0_i32_0 = arith.constant 0 : i32
    %c0_i32_1 = arith.constant 0 : i32
    return %c0_i32, %c0_i32_0 : i32, i32
  }
  func.func @transform_3(%arg0: i32) -> (i32, i32) {
    %c0_i32 = arith.constant 0 : i32
    %c0_i32_0 = arith.constant 0 : i32
    %c0_i32_1 = arith.constant 0 : i32
    return %c0_i32, %c0_i32_0 : i32, i32
  }
  func.func @transform_4(%arg0: i32) -> (i32, i32) {
    %c0_i32 = arith.constant 0 : i32
    %c0_i32_0 = arith.constant 0 : i32
    %c0_i32_1 = arith.constant 0 : i32
    return %c0_i32, %c0_i32_0 : i32, i32
  }
  func.func @transform_5(%arg0: i32) -> (i32, i32) {
    %c0_i32 = arith.constant 0 : i32
    %c0_i32_0 = arith.constant 0 : i32
    %c0_i32_1 = arith.constant 0 : i32
    return %c0_i32, %c0_i32_0 : i32, i32
  }
  func.func @transform_6(%arg0: i32) -> (i32, i32) {
    %c0_i32 = arith.constant 0 : i32
    %c0_i32_0 = arith.constant 0 : i32
    %c0_i32_1 = arith.constant 0 : i32
    return %c0_i32, %c0_i32_0 : i32, i32
  }
  func.func @transform_7(%arg0: i32) -> (i32, i32) {
    %c0_i32 = arith.constant 0 : i32
    %c0_i32_0 = arith.constant 0 : i32
    %c0_i32_1 = arith.constant 0 : i32
    return %c0_i32, %c0_i32_0 : i32, i32
  }
  func.func @transform_8(%arg0: i32) -> (i32, i32, i32) {
    %c0_i32 = arith.constant 0 : i32
    %c0_i32_0 = arith.constant 0 : i32
    %c0_i32_1 = arith.constant 0 : i32
    return %arg0, %c0_i32, %c0_i32_0 : i32, i32, i32
  }
}

</mosaic_0001>

<bundles_post_ra>
// kernel: tpu_custom_call.1
= control target key start
LH: loop header
LB: loop body
LE: loop exit
PB: predicated region body
PF: predicated region fallthrough
CT: control target
= control target key end

     0   :  { %13 = vsyncpa [#allocation4], 0  ;;  %s1550_s0 = inlined_call_operand.hbm [shape: f32[2,16,256], index: 0, kind: input, shape index: {}]   ;;  %s1551_s1 = inlined_call_operand.vmem [shape: bf16[8,16], index: 1, kind: input, shape index: {}]   ;;  %s1552_s2 = inlined_call_operand.vmem [shape: bf16[8,72], index: 2, kind: input, shape index: {}]   ;;  %s1553_s3 = inlined_call_operand.vmem [shape: bf16[16,8], index: 3, kind: input, shape index: {}]   ;;  %s1554_s4 = inlined_call_operand.vmem [shape: f32[8,1], index: 4, kind: input, shape index: {}]   ;;  %s1555_s5 = inlined_call_operand.vmem [shape: f32[8,1], index: 5, kind: input, shape index: {}]   ;;  %s1556_s6 = inlined_call_operand.vmem [shape: f32[16,1], index: 6, kind: input, shape index: {}]   ;;  %s1557_s7 = inlined_call_operand.vmem [shape: f32[9,256], index: 7, kind: input, shape index: {}]   ;;  %s1558_s8 = inlined_call_operand.hbm [shape: f32[2,16,256], index: 8, kind: output, shape index: {}]  }
   0x1   :  { %15 = vsyncpa [#allocation4 + $0x1], 0 }
   0x2   :  { %16 = vsyncpa [#allocation5], 0 }
   0x3   :  { %18 = vsyncpa [#allocation5 + $0x1], 0  ;;  %s1260_s27 = smov 0   ;;  %s1262_s28 = smov 0  }
   0x4   :  { %s1264_s29 = smov 0   ;;  %s1266_s30 = smov 0  }
   0x5 LB: > { %s1281_s9 = sadd.s32 4294967295, %s1190_s30   ;;  %s958_s10 = sadd.s32 4294967294, %s1190_s30   ;;  %s1190_s30 = sphi %s1266_s30, %s1575_s30   ;;  %s1186_s29 = sphi %s1264_s29, %s1574_s29   ;;  %s1182_s28 = sphi %s1262_s28, %s1573_s28   ;;  %s1178_s27 = sphi %s1260_s27, %s1572_s27  }
   0x6   : > { %s1285_s11 = sadd.s32 1, %s1190_s30   ;;  %s31_s12 = sadd.s32 1, %s1186_s29 }
   0x7   : > { %s28_s13 = ssub.s32 %s1190_s30, %s1285_s11  ;;  %p38_p0 = scmp.ne.s32.totalorder %s1186_s29, %s1182_s28 }
   0x8   : > { %p29_p1 = scmp.eq.s32.totalorder %s28_s13, 0  ;;  %p39_p2 = scmp.eq.s32.totalorder %s1190_s30, 0 }
   0x9   : > { %p44_p3 = scmp.ne.s32.totalorder %s1182_s28, %s1178_s27  ;;  %p45_p4 = scmp.eq.s32.totalorder %s1281_s9, 0 }
   0xa   : > { %s1297_s14 = scalar_select %p29_p1, %s1186_s29, %s31_s12  }
   0xb   : > { %p1299_p5 = por %p39_p2, %p38_p0  ;;  %p1303_p6 = por %p45_p4, %p44_p3 }
   0xc   : > { %1561 = sst [smem:[#allocation9_spill]] %s1297_s14  ;;  %p215_p7 = scmp.eq.s32.totalorder %s1281_s9, 1 }
   0xd   : > { %s1563_s16 = scalar_select %p1303_p6, 1, 0 }
   0xe   : > { %p221_p8 = scmp.eq.s32.totalorder %s958_s10, 1  ;;  %p1000_p10 = scmp.lt.s32.totalorder %s1190_s30, 2 }
   0xf   : > { %p1310_p11 = por %p215_p7, %p38_p0  ;;  %s262_s19 = sand.u32 1, %s1186_s29  }
  0x10   : > { %p1314_p12 = por %p221_p8, %p44_p3  ;;  %s986_s20 = sshll.u32 %s1190_s30, 9 }
  0x11   : > { %s1564_s17 = scalar_select %p1310_p11, 1, 0 }
  0x12   : > { %s1565_s18 = scalar_select %p1314_p12, 1, 0 }
  0x13   : > { %s961_s21 = sshll.u32 %s262_s19, 5  ;;  %s1323_s24 = scalar_lea.hbm %s1550_s0, %s986_s20 }
  0x14   : > { %s266_s25 = scalar_lea.vmem [#allocation3], %s961_s21  ;;  %p1327_p13 = pnand %p1000_p10, %p1299_p5 }
  0x15   : > { %s273_s26 = sshll.u32 %s266_s25, 4  ;;  %s1333_s12 = scalar_lea.sflag [#allocation4], %s262_s19  ;;  %s1331_s26 = int_to_ptr.vmem [resolvable:$true] %s273_s26 }
  0x16   : > { %s1098_s13 = scalar_lea.hbm %s1323_s24, 512  ;;  %p1100_p1 = pneg %p1327_p13 }
  0x17   : > { %p1099_p0 = scmp.ne.s32.totalorder %s1323_s24, %s1098_s13  ;;  %s1103_s21 = scalar_lea.hbm %s1550_s0, 1024 }
  0x18   : > { %p1104_p4 = scmp.lt.s32.totalorder %s1323_s24, %s1550_s0  ;;  %p1105_p5 = scmp.lt.s32.totalorder %s1103_s21, %s1098_s13 }
  0x19   : > { %p1101_p2 = pnand %p1100_p1, %p1099_p0 }
  0x1a   : > { %p1106_p7 = por %p1105_p5, %p1104_p4 }
  0x1b   : > { %p1102_p3 = pneg %p1101_p2 }
  0x1d   : > { %p1107_p8 = pnand %p1106_p7, %p1102_p3 }
  0x1f   : > { %1110 = shalt.err (!%p1107_p8)
}
  0x20   : > { %s1111_s19 = scalar_lea.vmem %s1331_s26, 512  ;;  %s1192_s25 = smov [#allocation3]  }
  0x21   : > { %p1112_p10 = scmp.ne.s32.totalorder %s1331_s26, %s1111_s19  ;;  %s1116_s14 = sshll.u32 %s1192_s25, 4  ;;  %s1117_s14 = int_to_ptr.vmem [resolvable:$false] %s1116_s14 }
  0x22   : > { %s1118_s20 = scalar_lea.vmem %s1117_s14, 1024  ;;  %p1119_p2 = scmp.lt.s32.totalorder %s1331_s26, %s1117_s14 }
  0x23   : > { %p1114_p9 = pnand %p1112_p10, %p1100_p1  ;;  %p1120_p12 = scmp.lt.s32.totalorder %s1118_s20, %s1111_s19 }
  0x25   : > { %p1115_p0 = pneg %p1114_p9  ;;  %p1121_p11 = por %p1120_p12, %p1119_p2 }
  0x27   : > { %p1122_p6 = pnand %p1121_p11, %p1115_p0 }
  0x29   : > { %1125 = shalt.err (!%p1122_p6)
}
  0x2a   : > { %s1193_s13 = smov 256   ;;  %s1194_s22 = smov 16  }
  0x2b   : > { %995 = dma.hbm_to_vmem [thread:$0]  (!%p1327_p13), %s1323_s24, 512, %s1331_s26, %s1333_s12, %s1193_s13, %s1193_s13, %s1194_s22  }
  0x2c   : > { %p964_p9 = scmp.ge.s32.totalorder %s1190_s30, 1  ;;  %p281_p1 = scmp.lt.s32.totalorder %s1190_s30, 3 }
  0x2e   : > { %p282_p3 = pnand %p964_p9, %p281_p1 }
  0x2f   : > { %s1357_s14 = sand.u32 (!%p282_p3), 1, %s1182_s28   ;;  %p1567_p6 = scmp.ne.s32.totalorder (!%p282_p3), %s1563_s16, 0 }
  0x30   : > { %285 = sbr.rel (%p282_p3) target bundleno = 961 (0x3c1), region = 52  ;;  %s965_s21 = sshll.u32 (!%p282_p3), %s1357_s14, 5 }
  0x31   : > { %s288_s15 = scalar_lea.sflag (!%p282_p3), [#allocation4], %s1357_s14  ;;  %s291_s23 = scalar_lea.vmem (!%p282_p3), [#allocation3], %s965_s21 }
  0x35   : > { %1169 = dma.done.wait (%p1567_p6), %s288_s15, 512  }
  0x36   : > { %1171 = vsyncadd (%p1567_p6), %s288_s15, 4294966784  ;;  %v408_v0 = vlaneseq  ;;  %v1195_v1 = vmov 0   ;;  %v1371_v5 = vld [vmem:[%s291_s23 + $0x8] sm:$0xff]  ;;  %v1373_v6 = vld [vmem:[%s291_s23 + $0x18] sm:$0xff]  ;;  %vm338_vm0 = vcmask 130048   ;;  %s1196_s25 = smov 34  }
  0x37   : > { %374 = vmatprep.mubr.bf16.mxu0 %v1195_v1  ;;  %1055 = vset.pattern.permute.xlu0 %v1195_v1  ;;  %v1375_v7 = vld [vmem:[%s291_s23] sm:$0xff]  ;;  %v331_v8 = vpack.c.bf16 %v1373_v6, %v1371_v5  ;;  %v1379_v9 = vld [vmem:[%s291_s23 + $0x10] sm:$0xff]  ;;  %v332_v10 = vld [vmem:[%s1554_s4] sm:$0xff]  ;;  %s1197_s22 = smov 32   ;;  %vm387_vm1 = vcmask 277504   ;;  %v1198_v19 = vmov 0.0  }
  0x38   : > { %v409_v2 = vshrl.u32 %v408_v0, 7  ;;  %774 = vmatprep.mubr.bf16.mxu1 %v1195_v1  ;;  %1096 = vset.pattern.permute.xlu1 %v1195_v1  ;;  %v330_v11 = vpack.c.bf16 %v1379_v9, %v1375_v7  ;;  %v975_v12 = vld [vmem:[%s1557_s7 + $0x10] ss:$8 sm:$0x3]  ;;  %v329_v15 = vld [vmem:[%s1551_s1] sm:$0xf] }
  0x39   : > { %335 = vperm.xlu0 %1055, %v332_v10   ;;  %356 = vmatprep.subr.bf16.mxu0 %v331_v8  ;;  %v973_v16 = vld [vmem:[%s1557_s7 + $0x6] ss:$8 sm:$0x3]  ;;  %388 = vst.msk [vmem:[#allocation2 + $0x10] sm:$0xff] %vm387_vm1, %v1198_v19  ;;  %385 = vst [vmem:[#allocation2] sm:$0xff] %v1198_v19  ;;  %s1199_s16 = smov 17  }
  0x3a   : > { %v1367_v3 = vsub.s32 1, %v409_v2  ;;  %v1369_v4 = vsub.s32 0, %v409_v2  ;;  %357 = vmatpush1.bf16.msra.mxu0 %v330_v11  ;;  %v974_v24 = vld [vmem:[%s1557_s7 + $0x7] ss:$8 sm:$0x3]  ;;  %s1200_s10 = smov 33  }
  0x3b   : > { %v971_v31 = vld [vmem:[%s1557_s7 + $0x4] ss:$8 sm:$0x3]  ;;  %v972_v34 = vld [vmem:[%s1557_s7 + $0x5] ss:$8 sm:$0x3] }
  0x3c   : > { %v590_v13 = vrot.slane %v975_v12, %v1367_v3  ;;  %v586_v14 = vrot.slane %v975_v12, %v1369_v4  ;;  %v544_v17 = vrot.slane %v973_v16, %v1367_v3  ;;  %v540_v18 = vrot.slane %v973_v16, %v1369_v4  ;;  %v969_v37 = vld [vmem:[%s1557_s7 + $0x2] ss:$8 sm:$0x3]  ;;  %s1201_s13 = smov 18   ;;  %s1202_s23 = smov 2  }
  0x3d   : > { %967 = vmatmul.mubr.msk.bf16.vlgmr.msra.gmra.mxu0 %vm338_vm0, %v329_v15  ;;  %v567_v29 = vrot.slane %v974_v24, %v1367_v3  ;;  %v563_v32 = vrot.slane %v974_v24, %v1369_v4  ;;  %v499_v33 = vrot.slane %v971_v31, %v1367_v3  ;;  %v495_v35 = vrot.slane %v971_v31, %v1369_v4  ;;  %v970_v40 = vld [vmem:[%s1557_s7 + $0x3] ss:$8 sm:$0x3]  ;;  %v968_v43 = vld [vmem:[%s1557_s7 + $0x1] ss:$8 sm:$0x3] }
  0x3e   : > { %591 = vrot.lane.b32.xlu1 %v586_v14, %s1196_s25  ;;  %593 = vrot.lane.b32.xlu0 %v590_v13, %s1196_s25  ;;  %v521_v36 = vrot.slane %v972_v34, %v1367_v3  ;;  %v517_v38 = vrot.slane %v972_v34, %v1369_v4  ;;  %v454_v39 = vrot.slane %v969_v37, %v1367_v3  ;;  %vm400_vm2 = vcmask 1047688   ;;  %s1205_s12 = smov 95   ;;  %s1206_s19 = smov 96  }
  0x3f   : > { %848 = vmatprep.mubr.bf16.mxu0 %v1195_v1  ;;  %v450_v41 = vrot.slane %v969_v37, %v1369_v4  ;;  %v477_v42 = vrot.slane %v970_v40, %v1367_v3  ;;  %v473_v44 = vrot.slane %v970_v40, %v1369_v4  ;;  %v431_v45 = vrot.slane %v968_v43, %v1367_v3  ;;  %s1207_s25 = smov 111   ;;  %s1208_s20 = smov 110  }
  0x40   : > { %v427_v46 = vrot.slane %v968_v43, %v1369_v4  ;;  %vm395_vm3 = vcmask 138240   ;;  %vm572_vm4 = vcmask 269312   ;;  %vm526_vm5 = vcmask 146432   ;;  %s1211_s15 = smov 112   ;;  %s323_s26 = scalar_lea.vmem [#allocation6], %s965_s21 }
  0x41   : > { %vm549_vm6 = vcmask 261120   ;;  %vm459_vm7 = vcmask 15360   ;;  %vm436_vm8 = vcmask 7168   ;;  %vm709_vm9 = vcmask 769024   ;;  %p1568_p12 = scmp.ne.s32.totalorder %s1564_s17, 0 }
  0x42   : > { %547 = vrot.lane.b32.xlu0 %v544_v17, %s1197_s22  ;;  %545 = vrot.lane.b32.xlu1 %v540_v18, %s1197_s22  ;;  %s1210_s22 = smov 126   ;;  %vm735_vm10 = vcmask 1043456   ;;  %vm681_vm11 = vcmask 785408   ;;  %vm695_vm12 = vcmask 777216   ;;  %vm667_vm13 = vcmask 900096  }
  0x43   : > { %vm653_vm14 = vcmask 908288   ;;  %vm625_vm15 = vcmask 1031168  }
  0xb0   : > { %v592_v48 = vpop.permute.xlu1 %591 }
  0xb4   : > { %v336_v20 = vpop.permute.xlu0 %335  ;;  %v546_v50 = vpop.permute.xlu1 %545 }
  0xb8   : > { %v594_v47 = vpop.permute.xlu0 %593 }
  0xb9   : > { %v595_v15 = vsel %vm387_vm1, %v592_v48, %v594_v47  ;;  %vm611_vm1 = vcmask 1039360  }
  0xbc   : > { %v548_v49 = vpop.permute.xlu0 %547 }
  0xfd   : > { %v376_v21 = vpop.f32.mrf.mxu0 }
  0xfe   : > { %v377_v22 = vadd.f32 %v376_v21, %v336_v20 }
  0xff   : > { %v378_v23 = vpop.f32.mrf.mxu0 }
 0x100   : > { %v383_v25 = vmax.f32 %v377_v22, 0.0  ;;  %v379_v26 = vadd.f32 %v378_v23, %v336_v20 }
 0x101   : > { %v380_v27 = vpop.f32.mrf.mxu0 }
 0x102   : > { %v384_v28 = vmax.f32 %v379_v26, 0.0  ;;  %391 = vrot.lane.b32.xlu0 %v383_v25, %s1199_s16  ;;  %v550_v25 = vsel %vm549_vm6, %v546_v50, %v548_v49 }
 0x103   : > { %v381_v30 = vpop.f32.mrf.mxu0 }
 0x104   : > { %393 = vrot.lane.b32.xlu1 %v384_v28, %s1199_s16 }
 0x106   : > { %570 = vrot.lane.b32.xlu0 %v567_v29, %s1200_s10 }
 0x108   : > { %568 = vrot.lane.b32.xlu1 %v563_v32, %s1200_s10  ;;  %s1204_s10 = smov 1  }
 0x10a   : > { %502 = vrot.lane.b32.xlu0 %v499_v33, %s1199_s16 }
 0x10c   : > { %500 = vrot.lane.b32.xlu1 %v495_v35, %s1199_s16  ;;  %s1203_s16 = smov 16  }
 0x10e   : > { %524 = vrot.lane.b32.xlu0 %v521_v36, %s1201_s13 }
 0x110   : > { %522 = vrot.lane.b32.xlu1 %v517_v38, %s1201_s13  ;;  %s1209_s13 = smov 94  }
 0x112   : > { %457 = vrot.lane.b32.xlu0 %v454_v39, %s1202_s23 }
 0x114   : > { %455 = vrot.lane.b32.xlu1 %v450_v41, %s1202_s23  ;;  %s1212_s23 = smov 127  }
 0x116   : > { %480 = vrot.lane.b32.xlu0 %v477_v42, %s1203_s16 }
 0x118   : > { %478 = vrot.lane.b32.xlu1 %v473_v44, %s1203_s16 }
 0x11a   : > { %434 = vrot.lane.b32.xlu0 %v431_v45, %s1204_s10 }
 0x11c   : > { %432 = vrot.lane.b32.xlu1 %v427_v46, %s1204_s10  ;;  %s885_s10 = sshll.u32 %s323_s26, 4  ;;  %s1501_s10 = int_to_ptr.vmem [resolvable:$true] %s885_s10 }
 0x174   : > { %v392_v51 = vpop.permute.xlu0 %391 }
 0x175   : > { %401 = vst.msk [vmem:[#allocation2] sm:$0xff] %vm400_vm2, %v392_v51  ;;  %vm731_vm2 = vcmask 588800  }
 0x176   : > { %v394_v52 = vpop.permute.xlu1 %393 }
 0x177   : > { %v1434_v53 = vsel %vm395_vm3, %v392_v51, %v394_v52  ;;  %403 = vst.msk [vmem:[#allocation2 + $0x10] sm:$0xff] %vm395_vm3, %v394_v52  ;;  %v725_v51 = vld [vmem:[%s1555_s5] sm:$0xff]  ;;  %v790_v52 = vld [vmem:[%s1556_s6 + $0x8] sm:$0xff] }
 0x178   : > { %v571_v54 = vpop.permute.xlu0 %570  ;;  %v600_v18 = vmul.f32 %v595_v15, %v1434_v53  ;;  %v555_v29 = vmul.f32 %v550_v25, %v1434_v53 }
 0x17a   : > { %v569_v55 = vpop.permute.xlu1 %568 }
 0x17b   : > { %v573_v8 = vsel %vm572_vm4, %v569_v55, %v571_v54 }
 0x17c   : > { %v1437_v56 = vld [vmem:[#allocation2] sm:$0xff]  ;;  %v503_v57 = vpop.permute.xlu0 %502  ;;  %v578_v17 = vmul.f32 %v573_v8, %v1434_v53 }
 0x17d   : > { %v577_v58 = vmul.f32 %v569_v55, %v1437_v56  ;;  %v554_v59 = vmul.f32 %v546_v50, %v1437_v56  ;;  %v599_v14 = vmul.f32 %v592_v48, %v1437_v56  ;;  %v789_v50 = vld [vmem:[%s1556_s6] sm:$0xff] }
 0x17e   : > { %v501_v60 = vpop.permute.xlu1 %500  ;;  %v420_v1 = vld [vmem:[#allocation2 + $0x10] sm:$0xff] }
 0x17f   : > { %689 = vrot.lane.b32.xlu0 %v577_v58, %s1205_s12  ;;  %675 = vrot.lane.b32.xlu1 %v554_v59, %s1206_s19  ;;  %v508_v62 = vmul.f32 %v501_v60, %v1437_v56  ;;  %v579_v11 = vmul.f32 %v571_v54, %v420_v1  ;;  %v601_v13 = vmul.f32 %v594_v47, %v420_v1 }
 0x180   : > { %v525_v61 = vpop.permute.xlu0 %524  ;;  %v1056_v22 = vpack.i.bf16 %v600_v18, %v599_v14  ;;  %v556_v24 = vmul.f32 %v548_v49, %v420_v1  ;;  %v504_v26 = vsel %vm395_vm3, %v501_v60, %v503_v57  ;;  %v510_v30 = vmul.f32 %v503_v57, %v420_v1 }
 0x181   : > { %v1066_v23 = vpack.i.bf16 %v579_v11, %v578_v17  ;;  %v533_v28 = vmul.f32 %v525_v61, %v420_v1  ;;  %v509_v31 = vmul.f32 %v504_v26, %v1434_v53  ;;  %vm806_vm3 = vcmask 64512  }
 0x182   : > { %v523_v63 = vpop.permute.xlu1 %522  ;;  %v1061_v33 = vpack.i.bf16 %v556_v24, %v555_v29 }
 0x183   : > { %v531_v0 = vmul.f32 %v523_v63, %v1437_v56  ;;  %647 = vrot.lane.b32.xlu1 %v508_v62, %s1207_s25  ;;  %v527_v16 = vsel %vm526_vm5, %v523_v63, %v525_v61  ;;  %v1071_v40 = vpack.i.bf16 %v510_v30, %v509_v31 }
 0x184   : > { %v458_v2 = vpop.permute.xlu0 %457  ;;  %v532_v20 = vmul.f32 %v527_v16, %v1434_v53 }
 0x185   : > { %661 = vrot.lane.b32.xlu0 %v531_v0, %s1208_s20  ;;  %v466_v43 = vmul.f32 %v458_v2, %v420_v1 }
 0x186   : > { %v456_v10 = vpop.permute.xlu1 %455  ;;  %v1076_v34 = vpack.i.bf16 %v533_v28, %v532_v20 }
 0x187   : > { %v464_v12 = vmul.f32 %v456_v10, %v1437_v56  ;;  %v460_v35 = vsel %vm459_vm7, %v456_v10, %v458_v2 }
 0x188   : > { %v481_v21 = vpop.permute.xlu0 %480  ;;  %v465_v38 = vmul.f32 %v460_v35, %v1434_v53 }
 0x189   : > { %707 = vrot.lane.b32.xlu0 %v601_v13, %s1209_s13  ;;  %619 = vrot.lane.b32.xlu1 %v464_v12, %s1210_s22  ;;  %v488_v36 = vmul.f32 %v481_v21, %v420_v1 }
 0x18a   : > { %v479_v19 = vpop.permute.xlu1 %478  ;;  %v1081_v46 = vpack.i.bf16 %v466_v43, %v465_v38 }
 0x18b   : > { %v482_v27 = vsel %vm338_vm0, %v479_v19, %v481_v21  ;;  %v486_v44 = vmul.f32 %v479_v19, %v1437_v56  ;;  %vm639_vm0 = vcmask 916480  }
 0x18c   : > { %v487_v32 = vmul.f32 %v482_v27, %v1434_v53  ;;  %v435_v39 = vpop.permute.xlu0 %434 }
 0x18d   : > { %1057 = vrot.lane.b32.xlu1 %v1056_v22, %s1209_s13  ;;  %1067 = vrot.lane.b32.xlu0 %v1066_v23, %s1205_s12  ;;  %v443_v47 = vmul.f32 %v435_v39, %v420_v1  ;;  %s987_s12 = sshll.u32 %s1281_s9, 9  ;;  %s1126_s13 = scalar_lea.vmem %s1501_s10, 512 }
 0x18e   : > { %v433_v37 = vpop.permute.xlu1 %432  ;;  %v1086_v41 = vpack.i.bf16 %v488_v36, %v487_v32  ;;  %v406_v36 = vld [vmem:[%s1557_s7] ss:$8 sm:$0x3]  ;;  %p1127_p11 = scmp.ne.s32.totalorder %s1501_s10, %s1126_s13  ;;  %s1213_s9 = smov [#allocation6]  }
 0x18f   : > { %v437_v42 = vsel %vm436_vm8, %v433_v37, %v435_v39  ;;  %v441_v48 = vmul.f32 %v433_v37, %v1437_v56  ;;  %v411_v43 = vrot.slane %v406_v36, %v1369_v4 }
 0x190   : > { %v442_v45 = vmul.f32 %v437_v42, %v1434_v53  ;;  %p1128_p13 = pnand %p1127_p11, %p1568_p12 }
 0x191   : > { %1062 = vrot.lane.b32.xlu1 %v1061_v33, %s1206_s19  ;;  %1077 = vrot.lane.b32.xlu0 %v1076_v34, %s1208_s20  ;;  %s872_s20 = scalar_lea.sflag [#allocation5], %s1357_s14 }
 0x192   : > { %v1091_v49 = vpack.i.bf16 %v443_v47, %v442_v45  ;;  %p1129_p4 = pneg %p1128_p13 }
 0x195   : > { %1072 = vrot.lane.b32.xlu1 %v1071_v40, %s1207_s25  ;;  %1087 = vrot.lane.b32.xlu0 %v1086_v41, %s1211_s15  ;;  %s1506_s25 = scalar_lea.hbm %s1558_s8, %s987_s12 }
 0x199   : > { %1082 = vrot.lane.b32.xlu1 %v1081_v46, %s1210_s22  ;;  %633 = vrot.lane.b32.xlu0 %v486_v44, %s1211_s15  ;;  %v415_v44 = vrot.slane %v406_v36, %v1367_v3  ;;  %s1130_s22 = sshll.u32 %s1213_s9, 4  ;;  %s1131_s22 = int_to_ptr.vmem [resolvable:$false] %s1130_s22 }
 0x19a   : > { %s1132_s15 = scalar_lea.vmem %s1131_s22, 1024  ;;  %p1133_p5 = scmp.lt.s32.totalorder %s1501_s10, %s1131_s22 }
 0x19b   : > { %p1134_p7 = scmp.lt.s32.totalorder %s1132_s15, %s1126_s13 }
 0x19d   : > { %605 = vrot.lane.b32.xlu0 %v441_v48, %s1212_s23  ;;  %1092 = vrot.lane.b32.xlu1 %v1091_v49, %s1212_s23  ;;  %p1135_p8 = por %p1134_p7, %p1133_p5 }
 0x19f   : > { %p1136_p10 = pnand %p1135_p8, %p1129_p4 }
 0x1a1   : > { %793 = vperm.xlu0 %1055, %v789_v50   ;;  %728 = vperm.xlu1 %1096, %v725_v51  }
 0x1a5   : > { %798 = vperm.xlu1 %1096, %v790_v52  }
 0x1f1   : > { %v676_v54 = vpop.permute.xlu1 %675  ;;  %v690_v55 = vpop.permute.xlu0 %689 }
 0x1f5   : > { %v648_v57 = vpop.permute.xlu1 %647 }
 0x1f7   : > { %v662_v58 = vpop.permute.xlu0 %661 }
 0x1fb   : > { %v620_v59 = vpop.permute.xlu1 %619  ;;  %v708_v60 = vpop.permute.xlu0 %707 }
 0x1ff   : > { %v1058_v61 = vpop.permute.xlu1 %1057  ;;  %v1068_v62 = vpop.permute.xlu0 %1067 }
 0x200   : > { %v1060_v63 = vunpack.i.h.bf16 %v1058_v61  ;;  %v1059_v0 = vunpack.i.l.bf16 %v1058_v61  ;;  %v1070_v1 = vunpack.i.h.bf16 %v1068_v62  ;;  %v1069_v2 = vunpack.i.l.bf16 %v1068_v62  ;;  %v714_v61 = vld [vmem:[%s1552_s2] sm:$0xf] }
 0x202   : > { %v711_v8 = vsel %vm709_vm9, %v1060_v63, %v708_v60  ;;  %v710_v10 = vsel %vm709_vm9, %v1059_v0, %v1060_v63  ;;  %v697_v21 = vsel %vm695_vm12, %v1069_v2, %v1070_v1  ;;  %v696_v23 = vsel %vm695_vm12, %v690_v55, %v1069_v2 }
 0x203   : > { %v1063_v11 = vpop.permute.xlu1 %1062  ;;  %v1078_v12 = vpop.permute.xlu0 %1077  ;;  %v724_v13 = vpack.c.bf16 %v711_v8, %v711_v8  ;;  %v723_v14 = vpack.c.bf16 %v710_v10, %v710_v10  ;;  %v418_v55 = vmul.f32 %v411_v43, %v1437_v56 }
 0x204   : > { %v1065_v15 = vunpack.i.h.bf16 %v1063_v11  ;;  %v1064_v16 = vunpack.i.l.bf16 %v1063_v11  ;;  %v1080_v17 = vunpack.i.h.bf16 %v1078_v12  ;;  %v1079_v18 = vunpack.i.l.bf16 %v1078_v12 }
 0x205   : > { %976 = vmatprep.subr.msk.bf16.mxu1 %vm735_vm10, %v724_v13  ;;  %v737_v19 = vsel %vm735_vm10, %v723_v14, 0  ;;  %v1097_v14 = vld [vmem:[%s1553_s3] sm:$0xff]  }
 0x206   : > { %749 = vmatpush1.bf16.msra.mxu1 %v737_v19  ;;  %v683_v20 = vsel %vm681_vm11, %v1064_v16, %v1065_v15  ;;  %v682_v22 = vsel %vm681_vm11, %v676_v54, %v1064_v16  ;;  %v669_v30 = vsel %vm667_vm13, %v1079_v18, %v1080_v17  ;;  %v668_v31 = vsel %vm667_vm13, %v662_v58, %v1079_v18 }
 0x207   : > { %v1073_v24 = vpop.permute.xlu1 %1072  ;;  %v1088_v25 = vpop.permute.xlu0 %1087  ;;  %v722_v26 = vpack.c.bf16 %v697_v21, %v683_v20  ;;  %v721_v27 = vpack.c.bf16 %v696_v23, %v682_v22  ;;  %v419_v58 = vmul.f32 %v415_v44, %v1434_v53 }
 0x208   : > { %v1075_v28 = vunpack.i.h.bf16 %v1073_v24  ;;  %v1074_v29 = vunpack.i.l.bf16 %v1073_v24  ;;  %v1090_v32 = vunpack.i.h.bf16 %v1088_v25  ;;  %v1089_v33 = vunpack.i.l.bf16 %v1088_v25 }
 0x209   : > { %750 = vmatprep.subr.bf16.mxu1 %v722_v26 }
 0x20a   : > { %751 = vmatpush1.bf16.msra.mxu1 %v721_v27  ;;  %v655_v34 = vsel %vm653_vm14, %v1074_v29, %v1075_v28  ;;  %v654_v35 = vsel %vm653_vm14, %v648_v57, %v1074_v29  ;;  %v641_v48 = vsel %vm639_vm0, %v1089_v33, %v1090_v32 }
 0x20b   : > { %v1083_v37 = vpop.permute.xlu1 %1082  ;;  %v634_v38 = vpop.permute.xlu0 %633  ;;  %v720_v39 = vpack.c.bf16 %v669_v30, %v655_v34  ;;  %v719_v40 = vpack.c.bf16 %v668_v31, %v654_v35 }
 0x20c   : > { %v1085_v41 = vunpack.i.h.bf16 %v1083_v37  ;;  %v1084_v42 = vunpack.i.l.bf16 %v1083_v37  ;;  %v640_v46 = vsel %vm639_vm0, %v634_v38, %v1089_v33 }
 0x20d   : > { %752 = vmatprep.subr.bf16.mxu1 %v720_v39 }
 0x20e   : > { %v626_v45 = vsel %vm625_vm15, %v620_v59, %v1084_v42  ;;  %753 = vmatpush1.bf16.msra.mxu1 %v719_v40  ;;  %v627_v47 = vsel %vm625_vm15, %v1084_v42, %v1085_v41 }
 0x20f   : > { %v717_v49 = vpack.c.bf16 %v640_v46, %v626_v45  ;;  %v1093_v50 = vpop.permute.xlu1 %1092  ;;  %v718_v51 = vpack.c.bf16 %v641_v48, %v627_v47  ;;  %v606_v57 = vpop.permute.xlu0 %605 }
 0x210   : > { %v1095_v52 = vunpack.i.h.bf16 %v1093_v50  ;;  %v1094_v54 = vunpack.i.l.bf16 %v1093_v50 }
 0x211   : > { %754 = vmatprep.subr.bf16.mxu1 %v718_v51 }
 0x212   : > { %v612_v4 = vsel %vm611_vm1, %v606_v57, %v1094_v54  ;;  %755 = vmatpush1.bf16.msra.mxu1 %v717_v49  ;;  %v613_v3 = vsel %vm611_vm1, %v1094_v54, %v1095_v52 }
 0x213   : > { %v715_v59 = vpack.c.bf16 %v612_v4, %v418_v55  ;;  %v716_v60 = vpack.c.bf16 %v613_v3, %v419_v58 }
 0x215   : > { %756 = vmatprep.subr.bf16.mxu1 %v716_v60 }
 0x216   : > { %757 = vmatpush1.bf16.msra.mxu1 %v715_v59 }
 0x219   : > { %977 = vmatmul.mubr.msk.bf16.vlgmr.msra.gmra.mxu1 %vm731_vm2, %v714_v61 }
 0x21c   : > { %v729_v62 = vpop.permute.xlu1 %728  ;;  %v794_v15 = vpop.permute.xlu0 %793 }
 0x220   : > { %v799_v21 = vpop.permute.xlu1 %798 }
 0x2d9   : > { %v776_v63 = vpop.f32.mrf.mxu1 }
 0x2da   : > { %v777_v56 = vadd.f32 %v776_v63, %v729_v62 }
 0x2db   : > { %v778_v0 = vpop.f32.mrf.mxu1 }
 0x2dc   : > { %v783_v1 = vmax.f32 %v777_v56, 0.0  ;;  %v779_v2 = vadd.f32 %v778_v0, %v729_v62 }
 0x2dd   : > { %v780_v53 = vpop.f32.mrf.mxu1 }
 0x2de   : > { %v787_v8 = vpack.c.bf16 %v783_v1, %v783_v1  ;;  %v784_v10 = vmax.f32 %v779_v2, 0.0 }
 0x2df   : > { %v781_v11 = vpop.f32.mrf.mxu1 }
 0x2e0   : > { %v788_v12 = vpack.c.bf16 %v784_v10, %v784_v10  ;;  %v811_v13 = vsel %vm735_vm10, %v787_v8, 0 }
 0x2e2   : > { %979 = vmatprep.subr.msk.bf16.mxu0 %vm735_vm10, %v788_v12 }
 0x2e3   : > { %831 = vmatpush1.bf16.msra.mxu0 %v811_v13 }
 0x2e6   : > { %980 = vmatmul.mubr.msk.bf16.vlgmr.msra.gmra.mxu0 %vm806_vm3, %v1097_v14 }
 0x3a6   : > { %v850_v16 = vpop.f32.mrf.mxu0 }
 0x3a7   : > { %v851_v17 = vadd.f32 %v850_v16, %v794_v15 }
 0x3a8   : > { %v852_v18 = vpop.f32.mrf.mxu0 }
 0x3a9   : > { %v859_v19 = vadd.f32 %v851_v17, %v1375_v7  ;;  %v853_v20 = vadd.f32 %v852_v18, %v794_v15 }
 0x3aa   : > { %v854_v22 = vpop.f32.mrf.mxu0 }
 0x3ab   : > { %v863_v23 = vmax.f32 %v859_v19, 0.0  ;;  %v860_v24 = vadd.f32 %v853_v20, %v1371_v5  ;;  %v855_v25 = vadd.f32 %v854_v22, %v799_v21 }
 0x3ac   : > { %v856_v26 = vpop.f32.mrf.mxu0 }
 0x3ad   : > { %867 = vst [vmem:[%s323_s26] sm:$0xff] %v863_v23  ;;  %v864_v27 = vmax.f32 %v860_v24, 0.0  ;;  %v861_v28 = vadd.f32 %v855_v25, %v1379_v9  ;;  %v857_v29 = vadd.f32 %v856_v26, %v799_v21 }
 0x3af   : > { %868 = vst [vmem:[%s323_s26 + $0x8] sm:$0xff] %v864_v27  ;;  %v865_v7 = vmax.f32 %v861_v28, 0.0  ;;  %v862_v30 = vadd.f32 %v857_v29, %v1373_v6 }
 0x3b1   : > { %869 = vst [vmem:[%s323_s26 + $0x10] sm:$0xff] %v865_v7  ;;  %v866_v5 = vmax.f32 %v862_v30, 0.0 }
 0x3b3   : > { %870 = vst [vmem:[%s323_s26 + $0x18] sm:$0xff] %v866_v5 }
 0x3b4   : > { %1139 = shalt.err (!%p1136_p10)
}
 0x3b5   : > { %s1140_s23 = scalar_lea.hbm %s1506_s25, 512  ;;  %s1144_s12 = scalar_lea.hbm %s1558_s8, 1024 }
 0x3b6   : > { %p1141_p0 = scmp.ne.s32.totalorder %s1506_s25, %s1140_s23  ;;  %p1145_p1 = scmp.lt.s32.totalorder %s1506_s25, %s1558_s8 }
 0x3b7   : > { %p1146_p3 = scmp.lt.s32.totalorder %s1144_s12, %s1140_s23 }
 0x3b8   : > { %p1142_p2 = pnand %p1141_p0, %p1568_p12 }
 0x3b9   : > { %p1147_p6 = por %p1146_p3, %p1145_p1 }
 0x3ba   : > { %p1143_p9 = pneg %p1142_p2 }
 0x3bc   : > { %p1148_p11 = pnand %p1147_p6, %p1143_p9 }
 0x3be   : > { %1151 = shalt.err (!%p1148_p11)
}
 0x3bf   : > { %s1214_s13 = smov 256  }
 0x3c0   : > { %990 = dma.vmem_to_hbm [thread:$0]  (%p1568_p12), %s1501_s10, 512, %s1506_s25, %s872_s20, %s1214_s13, %s1214_s13, %s1203_s16  }
 0x3c1 PF: > { %s900_s9 = sand.u32 1, %s1178_s27   ;;  %p1569_p13 = scmp.ne.s32.totalorder %s1565_s18, 0 }
 0x3c2   : > { %p1570_p4 = scmp.ge.s32.totalorder %s1190_s30, 2  ;;  %s901_s22 = scalar_lea.sflag [#allocation5], %s900_s9 }
 0x3c4   : > { %p997_p5 = pnand %p1570_p4, %p1569_p13 }
 0x3c6   : > { %p998_p7 = pneg %p997_p5 }
 0x3c8   : > { %1173 = dma.done.wait (%p998_p7), %s901_s22, 512  }
 0x3c9   : > { %1175 = vsyncadd (%p998_p7), %s901_s22, 4294966784  ;;  %s1571_s17 = sld [smem:[#allocation9_spill]]  ;;  %p21_p8 = scmp.ge.s32.totalorder %s1285_s11, 4  }
 0x3ca   : > { %s1572_s27 = smov %s1182_s28  ;;  %s1573_s28 = smov %s1186_s29 }
 0x3cb   : > { %s1575_s30 = smov %s1285_s11  ;;  %23 = sbr.rel (!%p21_p8) target bundleno = 5 (0x5), region = 105 }
 0x3cf   : > { %s1574_s29 = smov %s1571_s17 }
 0x3d0   :  { %906 = vsyncpa [#allocation4], 1 }
 0x3d1   :  { %908 = vsyncpa [#allocation4 + $0x1], 1 }
 0x3d2   :  { %909 = vsyncpa [#allocation5], 1 }
 0x3d3   :  { %911 = vsyncpa [#allocation5 + $0x1], 1 }

</bundles_post_ra>
